<compile_context>
chip_gen: v7x
topology: tpu7x:2x2x1
jax: 0.10.0
libtpu: 0.0.40
codegen_flags: <defaults>
</compile_context>

<pallas_src>
import jax
import jax.numpy as jnp
import numpy as np
from jax import lax
from jax.experimental import pallas as pl
from jax.experimental.pallas import tpu as pltpu

EPS = 1e-5
LANE = 128          # channel dims padded to a multiple of this (lane-dense stores)
DEFAULT_TM = 512    # rows per M-tile (v5e/v6e sweet spot; use 256 / bf16 on v7x)


def _ceil_to(x, m):
    return (x + m - 1) // m * m


def _pad_to(a, axis, size):
    if a.shape[axis] == size:
        return a
    widths = [(0, 0)] * a.ndim
    widths[axis] = (0, size - a.shape[axis])
    return jnp.pad(a, widths)


def _pick_tm(m, cap):
    """Largest multiple-of-8 tile <= cap that divides m (avoids row padding)."""
    cap = max(8, min(cap, _ceil_to(m, 8)))
    cap -= cap % 8
    for t in range(cap, 7, -8):
        if m % t == 0:
            return t, m
    return cap, _ceil_to(m, cap)      # fallback: requires row padding + masking


def _pick_row_block(ho, wo, target_rows=512):
    """Largest divisor of ho such that rb*wo stays a reasonable matmul M dim."""
    best = 1
    for r in range(1, ho + 1):
        if ho % r == 0 and r * wo <= max(target_rows, wo):
            best = r
    return best


def _fold_bn(st, gb, m):
    """st=(sum,sumsq) rows (2,C) f32; gb=(gamma,beta) (2,C). -> (scale,shift)."""
    # TODO(synk): one-pass E[y^2]-E[y]^2 can cancel catastrophically for huge M;
    # switch to a shifted / two-pass accumulation for production batch sizes.
    mean = st[0] / m
    var = jnp.maximum(st[1] / m - mean * mean, 0.0)
    scale = gb[0] * lax.rsqrt(var + EPS)
    shift = gb[1] - mean * scale
    return jnp.stack([scale, shift], axis=0).astype(jnp.float32)


# ----------------------------------------------------------------------------
# Stage 1: conv1 (1x1) -- single pass: raw output + per-tile BN statistics.
# ----------------------------------------------------------------------------
def conv1x1_stats(x_mat, w, *, tm, out_dtype):
    """x_mat (Mp, K) zero-row-padded; w (K, C). Returns raw y (Mp, C) and
       per-tile (n_tiles, 2, C) [sum, sumsq] f32 statistics."""
    mp, k = x_mat.shape
    c = w.shape[1]
    n_m = mp // tm

    def kernel(x_ref, w_ref, y_ref, st_ref):
        y = jnp.dot(x_ref[...], w_ref[...], preferred_element_type=jnp.float32)
        y_ref[...] = y.astype(y_ref.dtype)
        # zero-padded rows of x give y == 0 -> contribute nothing to the sums
        st_ref[0, 0:1, :] = jnp.sum(y, axis=0, keepdims=True)
        st_ref[0, 1:2, :] = jnp.sum(y * y, axis=0, keepdims=True)

    return pl.pallas_call(
        kernel,
        out_shape=(jax.ShapeDtypeStruct((mp, c), out_dtype),
                   jax.ShapeDtypeStruct((n_m, 2, c), jnp.float32)),
        grid=(n_m,),
        in_specs=[pl.BlockSpec((tm, k), lambda m: (m, 0)),
                  pl.BlockSpec((k, c), lambda m: (0, 0))],       # resident W1
        out_specs=(pl.BlockSpec((tm, c), lambda m: (m, 0)),
                   pl.BlockSpec((1, 2, c), lambda m: (m, 0, 0))),
        compiler_params=pltpu.CompilerParams(
            dimension_semantics=("parallel",)),
    )(x_mat, w)


# ----------------------------------------------------------------------------
# Stage 2: bn1-apply + ReLU (fused on load) -> conv2 (3x3, stride, pad=1).
# The kernel zero-pads the image into a VMEM scratch, builds an im2col row block
# in VMEM and runs one big-K matmul per row block.  Emits raw y2 + per-image
# partial BN2 stats; bn2+ReLU are folded into stage 3 so the normalized out2
# never touches HBM.
# ----------------------------------------------------------------------------
def _conv3x3_kernel(h, w, ho, wo, s, rb, c1, c2):
    n_rb = ho // rb

    def kernel(y1_ref, ss1_ref, w2_ref, y2_ref, st_ref, pad_ref, col_ref):
        cdt = pad_ref.dtype
        # halo must be exactly zero (zero-padding of relu(bn1(y1)))
        pad_ref[...] = jnp.zeros_like(pad_ref)
        scale1 = ss1_ref[0:1, :]
        shift1 = ss1_ref[1:2, :]

        # fill the interior with bn1-affine + ReLU applied to the raw conv1 out
        def fill_row(r, carry):
            row = y1_ref[0, pl.ds(r * w, w), :].astype(jnp.float32)
            act = jnp.maximum(row * scale1 + shift1, 0.0)
            pad_ref[r + 1, pl.ds(1, w), :] = act.astype(cdt)
            return carry

        lax.fori_loop(0, h, fill_row, 0)

        # conv 3x3: per output-row block, build im2col in VMEM, one big-K matmul
        def rb_body(b, carry):
            s0, s1 = carry
            oh0 = b * rb
            for rl in range(rb):                         # static (rb <= ~16)
                row0 = s * oh0 + s * rl
                for kh in range(3):
                    for kw in range(3):
                        tap = kh * 3 + kw
                        if s == 1:
                            v = pad_ref[row0 + kh, pl.ds(kw, wo), :]
                        else:
                            v = pad_ref[row0 + kh, pl.ds(kw, wo, stride=s), :]
                        col_ref[pl.ds(rl * wo, wo), pl.ds(tap * c1, c1)] = v
            blk = jnp.dot(col_ref[...], w2_ref[...],
                          preferred_element_type=jnp.float32)     # (rb*wo, c2)
            y2_ref[0, pl.ds(oh0 * wo, rb * wo), :] = blk.astype(y2_ref.dtype)
            s0 = s0 + jnp.sum(blk, axis=0, keepdims=True)
            s1 = s1 + jnp.sum(blk * blk, axis=0, keepdims=True)
            return (s0, s1)

        zero = jnp.zeros((1, c2), jnp.float32)
        s0, s1 = lax.fori_loop(0, n_rb, rb_body, (zero, zero))
        st_ref[0, 0:1, :] = s0
        st_ref[0, 1:2, :] = s1

    return kernel


def conv3x3_stats(y1_img, ss1, w2col, *, h, w, ho, wo, stride, out_dtype):
    """y1_img (N, h*w, Cin) raw conv1 output; ss1 (2, Cin) bn1 scale/shift;
       w2col (9*Cin, Cout).  Returns y2 (N, ho*wo, Cout) raw and (N, 2, Cout)
       partial BN stats."""
    n = y1_img.shape[0]
    c1 = y1_img.shape[2]
    c2 = w2col.shape[1]
    rb = _pick_row_block(ho, wo)
    kernel = _conv3x3_kernel(h, w, ho, wo, stride, rb, c1, c2)
    return pl.pallas_call(
        kernel,
        out_shape=(jax.ShapeDtypeStruct((n, ho * wo, c2), out_dtype),
                   jax.ShapeDtypeStruct((n, 2, c2), jnp.float32)),
        grid=(n,),
        in_specs=[pl.BlockSpec((1, h * w, c1), lambda i: (i, 0, 0)),
                  pl.BlockSpec((2, c1), lambda i: (0, 0)),        # bn1 scale/shift
                  pl.BlockSpec((9 * c1, c2), lambda i: (0, 0))],  # resident W2
        out_specs=(pl.BlockSpec((1, ho * wo, c2), lambda i: (i, 0, 0)),
                   pl.BlockSpec((1, 2, c2), lambda i: (i, 0, 0))),
        scratch_shapes=[pltpu.VMEM((h + 2, w + 2, c1), out_dtype),   # padded img
                        pltpu.VMEM((rb * wo, 9 * c1), out_dtype)],   # im2col blk
        compiler_params=pltpu.CompilerParams(
            dimension_semantics=("parallel",)),   # independent per image
    )(y1_img, ss1, w2col)


# ----------------------------------------------------------------------------
# Stage 3a (stats): bn2-apply+ReLU -> conv3 (1x1) [-> shortcut conv] -> per-tile
# sums / sumsq only.  Single "parallel" grid axis; residual never read here.
# ----------------------------------------------------------------------------
def _stage3_stats_kernel(m_true, tm, needs_mask, downsample):
    def kernel(*refs):
        if downsample:
            y2_ref, ss2_ref, w3_ref, xs_ref, ws_ref, st_ref = refs
        else:
            y2_ref, ss2_ref, w3_ref, st_ref = refs
        out2 = jnp.maximum(
            y2_ref[...].astype(jnp.float32) * ss2_ref[0:1, :] + ss2_ref[1:2, :],
            0.0)
        y3 = jnp.dot(out2.astype(w3_ref.dtype), w3_ref[...],
                     preferred_element_type=jnp.float32)
        if needs_mask:   # zero-padded rows must not pollute the statistics
            rows = (pl.program_id(0) * tm
                    + lax.broadcasted_iota(jnp.int32, (tm, 1), 0))
            valid = (rows < m_true).astype(jnp.float32)
            y3 = y3 * valid
        st_ref[0, 0:1, :] = jnp.sum(y3, axis=0, keepdims=True)
        st_ref[0, 1:2, :] = jnp.sum(y3 * y3, axis=0, keepdims=True)
        if downsample:
            ys = jnp.dot(xs_ref[...], ws_ref[...],
                         preferred_element_type=jnp.float32)
            if needs_mask:
                ys = ys * valid
            st_ref[0, 2:3, :] = jnp.sum(ys, axis=0, keepdims=True)
            st_ref[0, 3:4, :] = jnp.sum(ys * ys, axis=0, keepdims=True)
    return kernel


def stage3_stats(y2f, ss2, w3, *, m_true, tm, needs_mask, xs=None, ws=None):
    mp, c2 = y2f.shape
    c3 = w3.shape[1]
    n_m = mp // tm
    downsample = xs is not None
    n_stat = 4 if downsample else 2
    in_specs = [pl.BlockSpec((tm, c2), lambda m: (m, 0)),
                pl.BlockSpec((2, c2), lambda m: (0, 0)),
                pl.BlockSpec((c2, c3), lambda m: (0, 0))]
    inputs = [y2f, ss2, w3]
    if downsample:
        cin = xs.shape[1]
        in_specs += [pl.BlockSpec((tm, cin), lambda m: (m, 0)),
                     pl.BlockSpec((cin, c3), lambda m: (0, 0))]
        inputs += [xs, ws]
    return pl.pallas_call(
        _stage3_stats_kernel(m_true, tm, needs_mask, downsample),
        out_shape=jax.ShapeDtypeStruct((n_m, n_stat, c3), jnp.float32),
        grid=(n_m,),
        in_specs=in_specs,
        out_specs=pl.BlockSpec((1, n_stat, c3), lambda m: (m, 0, 0)),
        compiler_params=pltpu.CompilerParams(
            dimension_semantics=("parallel",)),
    )(*inputs)


# ----------------------------------------------------------------------------
# Stage 3b (apply): bn2+ReLU -> conv3 -> BN3 (+ shortcut conv+BN or identity)
# -> add -> ReLU, all fused.  Single "parallel" grid axis.
# ----------------------------------------------------------------------------
def _stage3_apply_kernel(downsample):
    def kernel(*refs):
        if downsample:
            (y2_ref, ss2_ref, w3_ref, ss3_ref,
             xs_ref, ws_ref, sss_ref, o_ref) = refs
        else:
            y2_ref, ss2_ref, w3_ref, ss3_ref, xid_ref, o_ref = refs
        out2 = jnp.maximum(
            y2_ref[...].astype(jnp.float32) * ss2_ref[0:1, :] + ss2_ref[1:2, :],
            0.0)
        y3 = jnp.dot(out2.astype(w3_ref.dtype), w3_ref[...],
                     preferred_element_type=jnp.float32)
        out = y3 * ss3_ref[0:1, :] + ss3_ref[1:2, :]
        if downsample:
            ys = jnp.dot(xs_ref[...], ws_ref[...],
                         preferred_element_type=jnp.float32)
            out = out + ys * sss_ref[0:1, :] + sss_ref[1:2, :]
        else:
            out = out + xid_ref[...].astype(jnp.float32)
        o_ref[...] = jnp.maximum(out, 0.0).astype(o_ref.dtype)
    return kernel


def stage3_apply(y2f, ss2, w3, ss3, *, tm, out_dtype,
                 xs=None, ws=None, sss=None, xid=None):
    mp, c2 = y2f.shape
    c3 = w3.shape[1]
    n_m = mp // tm
    downsample = xs is not None
    in_specs = [pl.BlockSpec((tm, c2), lambda m: (m, 0)),
                pl.BlockSpec((2, c2), lambda m: (0, 0)),
                pl.BlockSpec((c2, c3), lambda m: (0, 0)),
                pl.BlockSpec((2, c3), lambda m: (0, 0))]
    inputs = [y2f, ss2, w3, ss3]
    if downsample:
        cin = xs.shape[1]
        in_specs += [pl.BlockSpec((tm, cin), lambda m: (m, 0)),
                     pl.BlockSpec((cin, c3), lambda m: (0, 0)),
                     pl.BlockSpec((2, c3), lambda m: (0, 0))]
        inputs += [xs, ws, sss]
    else:
        in_specs += [pl.BlockSpec((tm, c3), lambda m: (m, 0))]
        inputs += [xid]
    return pl.pallas_call(
        _stage3_apply_kernel(downsample),
        out_shape=jax.ShapeDtypeStruct((mp, c3), out_dtype),
        grid=(n_m,),
        in_specs=in_specs,
        out_specs=pl.BlockSpec((tm, c3), lambda m: (m, 0)),
        compiler_params=pltpu.CompilerParams(
            dimension_semantics=("parallel",)),
    )(*inputs)


# ----------------------------------------------------------------------------
# Parameter preparation (hoisted out of the forward): transpose + pad weights,
# stack gamma/beta, cast matmul operands to the compute dtype (f32 or bf16).
# ----------------------------------------------------------------------------
def prepare_params(params, *, in_planes, planes, stride, dtype=jnp.float32):
    cout = 4 * planes
    cin_p = _ceil_to(in_planes, LANE)
    c1_p = _ceil_to(planes, LANE)
    c2_p = _ceil_to(planes, LANE)
    c3_p = _ceil_to(cout, LANE)

    def mat(wt, rows, cols):            # (O, I, 1, 1) -> padded (I_p, O_p)
        o, i = wt.shape[0], wt.shape[1]
        m2d = wt.reshape(o, i).T
        return jnp.pad(m2d, ((0, rows - i), (0, cols - o))).astype(dtype)

    def gb(g, b, cols):
        return jnp.pad(jnp.stack([g, b], axis=0),
                       ((0, 0), (0, cols - g.shape[0]))).astype(jnp.float32)

    # im2col weight: rows ordered [tap(kh*3+kw)][in_channel], cols = out channels
    w2 = params["w2"].transpose(2, 3, 1, 0).reshape(9, planes, planes)
    w2 = jnp.pad(w2, ((0, 0), (0, c1_p - planes),
                      (0, c2_p - planes))).astype(dtype)
    w2col = w2.reshape(9 * c1_p, c2_p)

    prep = {
        "w1": mat(params["w1"], cin_p, c1_p),
        "w2": w2col,
        "w3": mat(params["w3"], c2_p, c3_p),
        "gb1": gb(params["g1"], params["b1"], c1_p),
        "gb2": gb(params["g2"], params["b2"], c2_p),
        "gb3": gb(params["g3"], params["b3"], c3_p),
        "dims": (in_planes, planes, cout, cin_p, c1_p, c2_p, c3_p, stride),
    }
    if stride != 1 or in_planes != cout:
        prep["ws"] = mat(params["ws"], cin_p, c3_p)
        prep["gbs"] = gb(params["gs"], params["bs"], c3_p)
    return prep


# ----------------------------------------------------------------------------
# Bottleneck forward (Pallas)
# ----------------------------------------------------------------------------
def bottleneck_forward(x, prep, *, tm=DEFAULT_TM):
    in_planes, planes, cout, cin_p, c1_p, c2_p, c3_p, s = prep["dims"]
    n, cin, h, w = x.shape
    assert cin == in_planes
    ho = (h + 2 - 3) // s + 1
    wo = (w + 2 - 3) // s + 1
    dtype = prep["w1"].dtype    # compute / intermediate-activation dtype

    # NCHW -> channels-last once at the module boundary; lane-pad the channels.
    x_nhwc = _pad_to(jnp.transpose(x, (0, 2, 3, 1)).astype(dtype), 3, cin_p)

    # ---- stage 1: conv1 (1x1), raw output + stats in a single pass ----------
    m1 = n * h * w
    tm1, m1p = _pick_tm(m1, tm)
    x1 = x_nhwc.reshape(m1, cin_p)
    if m1p != m1:
        x1 = _pad_to(x1, 0, m1p)
    y1, st1 = conv1x1_stats(x1, prep["w1"], tm=tm1, out_dtype=dtype)
    if m1p != m1:
        y1 = y1[:m1]
    ss1 = _fold_bn(jnp.sum(st1, axis=0), prep["gb1"], m1)     # (2, c1_p) f32

    # ---- stage 2: bn1+ReLU fused in, 3x3 conv, raw output + stats -----------
    y1_img = y1.reshape(n, h * w, c1_p)                        # free reshape
    y2, st2 = conv3x3_stats(y1_img, ss1, prep["w2"], h=h, w=w, ho=ho, wo=wo,
                            stride=s, out_dtype=dtype)
    m2 = n * ho * wo
    ss2 = _fold_bn(jnp.sum(st2, axis=0), prep["gb2"], m2)      # (2, c2_p) f32

    # ---- stage 3: bn2+ReLU + conv3 + BN3 + shortcut + add + ReLU ------------
    tm2, m2p = _pick_tm(m2, tm)
    needs_mask = m2p != m2
    y2f = y2.reshape(m2, c2_p)
    if needs_mask:
        y2f = _pad_to(y2f, 0, m2p)
    downsample = (s != 1) or (in_planes != cout)
    if downsample:
        # TODO(synk): produce the strided shortcut input inside a kernel instead
        # of this XLA strided slice (one extra gather/copy over x).
        xs = x_nhwc[:, ::s, ::s, :].reshape(m2, cin_p)
        if needs_mask:
            xs = _pad_to(xs, 0, m2p)
        st3 = stage3_stats(y2f, ss2, prep["w3"], xs=xs, ws=prep["ws"],
                           m_true=m2, tm=tm2, needs_mask=needs_mask)
        st3 = jnp.sum(st3, axis=0)
        ss3 = _fold_bn(st3[0:2], prep["gb3"], m2)
        sss = _fold_bn(st3[2:4], prep["gbs"], m2)
        out = stage3_apply(y2f, ss2, prep["w3"], ss3, xs=xs, ws=prep["ws"],
                           sss=sss, tm=tm2, out_dtype=dtype)
    else:
        xid = x_nhwc.reshape(m2, c3_p)                         # cin_p == c3_p
        if needs_mask:
            xid = _pad_to(xid, 0, m2p)
        st3 = stage3_stats(y2f, ss2, prep["w3"], m_true=m2, tm=tm2,
                           needs_mask=needs_mask)
        ss3 = _fold_bn(jnp.sum(st3, axis=0), prep["gb3"], m2)
        out = stage3_apply(y2f, ss2, prep["w3"], ss3, xid=xid,
                           tm=tm2, out_dtype=dtype)

    # back to NCHW / f32 only at the module boundary (keep NHWC + compute dtype
    # between stacked bottlenecks in a full network).
    out = out[:m2].reshape(n, ho, wo, c3_p)[:, :, :, :cout]
    return jnp.transpose(out, (0, 3, 1, 2)).astype(jnp.float32)


# ----------------------------------------------------------------------------
# Pure-JAX reference (for verification)
# ----------------------------------------------------------------------------
def _ref_conv(x, w, stride, pad):
    return lax.conv_general_dilated(
        x, w, window_strides=(stride, stride),
        padding=[(pad, pad), (pad, pad)],
        dimension_numbers=("NCHW", "OIHW", "NCHW"))


def _ref_bn(y, g, b):
    mean = y.mean(axis=(0, 2, 3), keepdims=True)
    var = jnp.square(y - mean).mean(axis=(0, 2, 3), keepdims=True)
    return (g.reshape(1, -1, 1, 1) * (y - mean) / jnp.sqrt(var + EPS)
            + b.reshape(1, -1, 1, 1))


def bottleneck_reference(x, p, *, stride):
    out = jax.nn.relu(_ref_bn(_ref_conv(x, p["w1"], 1, 0), p["g1"], p["b1"]))
    out = jax.nn.relu(_ref_bn(_ref_conv(out, p["w2"], stride, 1), p["g2"], p["b2"]))
    out = _ref_bn(_ref_conv(out, p["w3"], 1, 0), p["g3"], p["b3"])
    cin, cout = x.shape[1], p["w3"].shape[0]
    if stride != 1 or cin != cout:
        sc = _ref_bn(_ref_conv(x, p["ws"], stride, 0), p["gs"], p["bs"])
    else:
        sc = x
    return jax.nn.relu(out + sc)


# ----------------------------------------------------------------------------
def _make_params(key, in_planes, planes, need_shortcut):
    cout = 4 * planes
    ks = jax.random.split(key, 12)
    p = {
        "w1": 0.1 * jax.random.normal(ks[0], (planes, in_planes, 1, 1), jnp.float32),
        "g1": 1.0 + 0.1 * jax.random.normal(ks[1], (planes,), jnp.float32),
        "b1": 0.1 * jax.random.normal(ks[2], (planes,), jnp.float32),
        "w2": 0.1 * jax.random.normal(ks[3], (planes, planes, 3, 3), jnp.float32),
        "g2": 1.0 + 0.1 * jax.random.normal(ks[4], (planes,), jnp.float32),
        "b2": 0.1 * jax.random.normal(ks[5], (planes,), jnp.float32),
        "w3": 0.1 * jax.random.normal(ks[6], (cout, planes, 1, 1), jnp.float32),
        "g3": 1.0 + 0.1 * jax.random.normal(ks[7], (cout,), jnp.float32),
        "b3": 0.1 * jax.random.normal(ks[8], (cout,), jnp.float32),
    }
    if need_shortcut:
        p["ws"] = 0.1 * jax.random.normal(ks[9], (cout, in_planes, 1, 1), jnp.float32)
        p["gs"] = 1.0 + 0.1 * jax.random.normal(ks[10], (cout,), jnp.float32)
        p["bs"] = 0.1 * jax.random.normal(ks[11], (cout,), jnp.float32)
    return p


if __name__ == "__main__":
    configs = [
        # downsample path (Bottleneck(4, 4, stride=2)), f32 everywhere
        dict(in_planes=4, planes=4, hw=16, stride=2, dtype=jnp.float32,
             rtol=5e-4, atol=5e-4),
        # identity-shortcut path (Bottleneck(16, 4, stride=1)), f32
        dict(in_planes=16, planes=4, hw=16, stride=1, dtype=jnp.float32,
             rtol=5e-4, atol=5e-4),
        # bf16 MXU operands / bf16 intermediates (looser check vs f32 reference)
        dict(in_planes=4, planes=4, hw=16, stride=2, dtype=jnp.bfloat16,
             rtol=1.5e-1, atol=1.5e-1),
    ]
    batch = 2
    for cfg in configs:
        in_planes, planes, hw, stride = (cfg["in_planes"], cfg["planes"],
                                         cfg["hw"], cfg["stride"])
        cout = 4 * planes
        need_short = (stride != 1) or (in_planes != cout)

        key = jax.random.PRNGKey(0)
        kp, kx = jax.random.split(key)
        params = _make_params(kp, in_planes, planes, need_short)
        x = jax.random.normal(kx, (batch, in_planes, hw, hw), jnp.float32)

        prep = prepare_params(params, in_planes=in_planes, planes=planes,
                              stride=stride, dtype=cfg["dtype"])
        out = jax.block_until_ready(bottleneck_forward(x, prep))

        ref = jax.block_until_ready(bottleneck_reference(x, params, stride=stride))
        assert out.shape == ref.shape, (out.shape, ref.shape)
        np.testing.assert_allclose(np.asarray(out), np.asarray(ref),
                                   rtol=cfg["rtol"], atol=cfg["atol"])

    print("KERNEL_OK")
</pallas_src>

<mosaic_0001>
module attributes {stable_mosaic.version = 11 : i64} {
  func.func @kernel(%arg0: i32, %arg1: memref<512x128xf32, #tpu.memory_space<vmem>>, %arg2: memref<128x128xf32, #tpu.memory_space<vmem>>, %arg3: memref<512x128xf32, #tpu.memory_space<vmem>>, %arg4: memref<1x2x128xf32, #tpu.memory_space<vmem>>) attributes {dimension_semantics = [#tpu.dimension_semantics<parallel>], iteration_bounds = array<i64: 1>, scalar_prefetch = 0 : i64, scratch_operands = 0 : i64, tpu.core_type = #tpu.core_type<tc>, window_params = [{transform_indices = @transform_0, window_bounds = array<i64: 512, 128>}, {pipeline_mode = #tpu.pipeline_mode<synchronous>, transform_indices = @transform_1, window_bounds = array<i64: 128, 128>}, {transform_indices = @transform_2, window_bounds = array<i64: 512, 128>}, {transform_indices = @transform_3, window_bounds = array<i64: 1, 2, 128>}]} {
    %c0 = arith.constant 0 : index
    %c0_0 = arith.constant 0 : index
    %0 = vector.load %arg1[%c0, %c0_0] : memref<512x128xf32, #tpu.memory_space<vmem>>, vector<512x128xf32>
    %c0_1 = arith.constant 0 : index
    %c0_2 = arith.constant 0 : index
    %1 = vector.load %arg2[%c0_1, %c0_2] : memref<128x128xf32, #tpu.memory_space<vmem>>, vector<128x128xf32>
    %cst = arith.constant dense<0.000000e+00> : vector<512x128xf32>
    %2 = tpu.matmul %0, %1, %cst {dimension_numbers = #tpu.dot_dimension_numbers<[1], [0], [0], [1], [0, 0, 1, 1], [], []>} : vector<512x128xf32>, vector<128x128xf32>, vector<512x128xf32> -> vector<512x128xf32>
    %c0_3 = arith.constant 0 : index
    %c0_4 = arith.constant 0 : index
    %3 = vector.load %arg3[%c0_3, %c0_4] : memref<512x128xf32, #tpu.memory_space<vmem>>, vector<512x128xf32>
    tpu.vector_store %arg3[%c0_3, %c0_4], %2 {strides = array<i32>} : memref<512x128xf32, #tpu.memory_space<vmem>>, vector<512x128xf32>,
    %cst_5 = arith.constant dense<0.000000e+00> : vector<128xf32>
    %4 = vector.multi_reduction <add>, %2, %cst_5 [0] : vector<512x128xf32> to vector<128xf32>
    %5 = vector.shape_cast %4 : vector<128xf32> to vector<1x128xf32>
    %c0_6 = arith.constant 0 : index
    %c0_7 = arith.constant 0 : index
    %c0_8 = arith.constant 0 : index
    %6 = vector.load %arg4[%c0_6, %c0_7, %c0_8] : memref<1x2x128xf32, #tpu.memory_space<vmem>>, vector<1x1x128xf32>
    %7 = vector.shape_cast %6 : vector<1x1x128xf32> to vector<1x128xf32>
    %8 = vector.shape_cast %5 : vector<1x128xf32> to vector<1x1x128xf32>
    tpu.vector_store %arg4[%c0_6, %c0_7, %c0_8], %8 {strides = array<i32>} : memref<1x2x128xf32, #tpu.memory_space<vmem>>, vector<1x1x128xf32>,
    %9 = arith.mulf %2, %2 : vector<512x128xf32>
    %cst_9 = arith.constant dense<0.000000e+00> : vector<128xf32>
    %10 = vector.multi_reduction <add>, %9, %cst_9 [0] : vector<512x128xf32> to vector<128xf32>
    %11 = vector.shape_cast %10 : vector<128xf32> to vector<1x128xf32>
    %c0_10 = arith.constant 0 : index
    %c1 = arith.constant 1 : index
    %c0_11 = arith.constant 0 : index
    %12 = vector.load %arg4[%c0_10, %c1, %c0_11] : memref<1x2x128xf32, #tpu.memory_space<vmem>>, vector<1x1x128xf32>
    %13 = vector.shape_cast %12 : vector<1x1x128xf32> to vector<1x128xf32>
    %14 = vector.shape_cast %11 : vector<1x128xf32> to vector<1x1x128xf32>
    tpu.vector_store %arg4[%c0_10, %c1, %c0_11], %14 {strides = array<i32>} : memref<1x2x128xf32, #tpu.memory_space<vmem>>, vector<1x1x128xf32>,
    return
  }
  func.func @transform_0(%arg0: i32) -> (i32, i32) {
    %c0_i32 = arith.constant 0 : i32
    %c0_i32_0 = arith.constant 0 : i32
    return %arg0, %c0_i32 : i32, i32
  }
  func.func @transform_1(%arg0: i32) -> (i32, i32) {
    %c0_i32 = arith.constant 0 : i32
    %c0_i32_0 = arith.constant 0 : i32
    %c0_i32_1 = arith.constant 0 : i32
    return %c0_i32, %c0_i32_0 : i32, i32
  }
  func.func @transform_2(%arg0: i32) -> (i32, i32) {
    %c0_i32 = arith.constant 0 : i32
    %c0_i32_0 = arith.constant 0 : i32
    return %arg0, %c0_i32 : i32, i32
  }
  func.func @transform_3(%arg0: i32) -> (i32, i32, i32) {
    %c0_i32 = arith.constant 0 : i32
    %c0_i32_0 = arith.constant 0 : i32
    %c0_i32_1 = arith.constant 0 : i32
    return %arg0, %c0_i32, %c0_i32_0 : i32, i32, i32
  }
}

</mosaic_0001>

<bundles_post_ra>
// kernel: tpu_custom_call.1
= control target key start
LH: loop header
LB: loop body
LE: loop exit
PB: predicated region body
PF: predicated region fallthrough
CT: control target
= control target key end

     0   :  { %9 = vsyncpa [#allocation3], 0  ;;  %s1441_s0 = inlined_call_operand.hbm [shape: f32[512,128], index: 0, kind: input, shape index: {}]   ;;  %s1442_s1 = inlined_call_operand.hbm [shape: f32[128,128], index: 1, kind: input, shape index: {}]   ;;  %s1443_s2 = inlined_call_operand.hbm [shape: f32[512,128], index: 2, kind: output, shape index: {0}]   ;;  %s1444_s3 = inlined_call_operand.hbm [shape: f32[1,2,128], index: 3, kind: output, shape index: {1}]  }
   0x1   :  { %10 = vsyncpa [#allocation6], 0 }
   0x2   :  { %11 = vsyncpa [#allocation4], 0 }
   0x3   :  { %12 = vsyncpa [#allocation9], 0  ;;  %s1166_s12 = smov [#allocation2]   ;;  %s1070_s16 = scalar_lea.hbm %s1441_s0, 8192 }
   0x4   :  { %s18_s13 = sshll.u32 %s1166_s12, 4  ;;  %p1071_p0 = scmp.ne.s32.totalorder %s1441_s0, %s1070_s16  ;;  %s19_s13 = int_to_ptr.vmem [resolvable:$true] %s18_s13 }
   0x5   :  { %p1074_p1 = scmp.lt.u32.totalorder %s1070_s16, %s1441_s0 }
   0x7   :  { %p1076_p2 = pnand %p1074_p1, %p1071_p0 }
   0x9   :  { %1079 = shalt.err (!%p1076_p2)
}
   0xa   :  { %s1080_s21 = scalar_lea.vmem %s19_s13, 8192  ;;  %p1085_p4 = scmp.lt.s32.totalorder %s19_s13, %s19_s13 }
   0xb   :  { %p1081_p3 = scmp.ne.s32.totalorder %s19_s13, %s1080_s21  ;;  %p1086_p5 = scmp.lt.s32.totalorder %s1080_s21, %s1080_s21 }
   0xd   :  { %p1087_p6 = por %p1086_p5, %p1085_p4 }
   0xf   :  { %p1088_p7 = pnand %p1087_p6, %p1081_p3 }
  0x11   :  { %1091 = shalt.err (!%p1088_p7)
}
  0x12   :  { %s1167_s22 = smov 128   ;;  %s1168_s23 = smov 8  }
  0x13   :  { %24 = dma.hbm_to_vmem [thread:$0]  %s1441_s0, 8192, %s19_s13, [#allocation3], %s1167_s22, %s1167_s22, %s1168_s23  }
  0x14   :  { %s1169_s26 = smov [#allocation5]   ;;  %s1092_s30 = scalar_lea.hbm %s1442_s1, 2048 }
  0x15   :  { %s30_s27 = sshll.u32 %s1169_s26, 4  ;;  %p1093_p8 = scmp.ne.s32.totalorder %s1442_s1, %s1092_s30  ;;  %s31_s27 = int_to_ptr.vmem [resolvable:$true] %s30_s27 }
  0x16   :  { %p1096_p9 = scmp.lt.u32.totalorder %s1092_s30, %s1442_s1 }
  0x18   :  { %p1098_p10 = pnand %p1096_p9, %p1093_p8 }
  0x1a   :  { %1101 = shalt.err (!%p1098_p10)
}
  0x1b   :  { %s1102_s8 = scalar_lea.vmem %s31_s27, 2048  ;;  %p1107_p12 = scmp.lt.s32.totalorder %s31_s27, %s31_s27 }
  0x1c   :  { %p1103_p11 = scmp.ne.s32.totalorder %s31_s27, %s1102_s8  ;;  %p1108_p13 = scmp.lt.s32.totalorder %s1102_s8, %s1102_s8 }
  0x1e   :  { %p1109_p0 = por %p1108_p13, %p1107_p12 }
  0x20   :  { %p1110_p1 = pnand %p1109_p0, %p1103_p11 }
  0x22   :  { %1113 = shalt.err (!%p1110_p1)
}
  0x23   :  { %36 = dma.hbm_to_vmem [thread:$0]  %s1442_s1, 2048, %s31_s27, [#allocation6], %s1167_s22, %s1167_s22, %s1168_s23  }
  0x24   :  { %1158 = dma.done.wait [#allocation3], 8192  }
  0x25   :  { %1159 = vsyncadd [#allocation3], 4294959104 }
  0x26   :  { %1160 = dma.done.wait [#allocation6], 2048  }
  0x27   :  { %1161 = vsyncadd [#allocation6], 4294965248  ;;  %v107_v0 = vld [vmem:[#allocation5] sm:$0xff]  ;;  %v108_v1 = vld [vmem:[#allocation5 + $0x8] sm:$0xff]  ;;  %s1170_s1 = smov [#allocation7]  }
  0x28   :  { %v109_v2 = vld [vmem:[#allocation5 + $0x10] sm:$0xff]  ;;  %v1016_v3 = vpack.c.bf16 %v108_v1, %v107_v0  ;;  %v110_v4 = vld [vmem:[#allocation5 + $0x18] sm:$0xff]  ;;  %v111_v6 = vld [vmem:[#allocation5 + $0x20] sm:$0xff]  ;;  %s781_s10 = sshll.u32 %s1170_s1, 4  ;;  %s782_s10 = int_to_ptr.vmem [resolvable:$true] %s781_s10 }
  0x29   :  { %v1020_v5 = vpack.c.bf16 %v110_v4, %v109_v2  ;;  %v112_v7 = vld [vmem:[#allocation5 + $0x28] sm:$0xff]  ;;  %v43_v9 = vld [vmem:[#allocation2] sm:$0xff]  ;;  %v113_v10 = vld [vmem:[#allocation5 + $0x30] sm:$0xff]  ;;  %s1114_s11 = scalar_lea.vmem %s782_s10, 8192  ;;  %p1119_p3 = scmp.lt.s32.totalorder %s782_s10, %s782_s10 }
  0x2a   :  { %1017 = vmatprep.subr.bf16.mxu0 %v1016_v3  ;;  %1048 = vmatprep.subr.bf16.mxu1 %v1016_v3  ;;  %v1024_v8 = vpack.c.bf16 %v112_v7, %v111_v6  ;;  %v114_v11 = vld [vmem:[#allocation5 + $0x38] sm:$0xff]  ;;  %v115_v13 = vld [vmem:[#allocation5 + $0x40] sm:$0xff]  ;;  %v116_v14 = vld [vmem:[#allocation5 + $0x48] sm:$0xff]  ;;  %p1115_p2 = scmp.ne.s32.totalorder %s782_s10, %s1114_s11  ;;  %p1120_p4 = scmp.lt.s32.totalorder %s1114_s11, %s1114_s11 }
  0x2b   :  { %1019 = vmatpush3.bf16.msra.mxu0 %v1016_v3  ;;  %1056 = vmatpush3.bf16.msra.mxu1 %v1016_v3  ;;  %v1028_v12 = vpack.c.bf16 %v114_v11, %v113_v10  ;;  %v1032_v15 = vpack.c.bf16 %v116_v14, %v115_v13  ;;  %v117_v16 = vld [vmem:[#allocation5 + $0x50] sm:$0xff]  ;;  %v118_v17 = vld [vmem:[#allocation5 + $0x58] sm:$0xff]  ;;  %v75_v18 = vld [vmem:[#allocation2 + $0x100] sm:$0xff] }
  0x2c   :  { %1021 = vmatprep.subr.bf16.mxu0 %v1020_v5  ;;  %1049 = vmatprep.subr.bf16.mxu1 %v1020_v5  ;;  %v1036_v19 = vpack.c.bf16 %v118_v17, %v117_v16  ;;  %v119_v20 = vld [vmem:[#allocation5 + $0x60] sm:$0xff]  ;;  %v120_v21 = vld [vmem:[#allocation5 + $0x68] sm:$0xff]  ;;  %v121_v23 = vld [vmem:[#allocation5 + $0x70] sm:$0xff]  ;;  %p1121_p5 = por %p1120_p4, %p1119_p3 }
  0x2d   :  { %920 = vmatprep.mubr.f32.mxu0 %v43_v9  ;;  %968 = vmatprep.mubr.f32.mxu1 %v75_v18  ;;  %v1040_v22 = vpack.c.bf16 %v120_v21, %v119_v20  ;;  %v122_v24 = vld [vmem:[#allocation5 + $0x78] sm:$0xff]  ;;  %v44_v26 = vld [vmem:[#allocation2 + $0x8] sm:$0xff]  ;;  %v45_v28 = vld [vmem:[#allocation2 + $0x10] sm:$0xff] }
  0x2e   :  { %v1044_v25 = vpack.c.bf16 %v122_v24, %v121_v23  ;;  %v76_v27 = vld [vmem:[#allocation2 + $0x108] sm:$0xff]  ;;  %v77_v29 = vld [vmem:[#allocation2 + $0x110] sm:$0xff]  ;;  %v46_v30 = vld [vmem:[#allocation2 + $0x18] sm:$0xff]  ;;  %p1122_p6 = pnand %p1121_p5, %p1115_p2 }
  0x2f   :  { %1023 = vmatpush3.bf16.msra.mxu0 %v1020_v5  ;;  %1057 = vmatpush3.bf16.msra.mxu1 %v1020_v5  ;;  %v78_v31 = vld [vmem:[#allocation2 + $0x118] sm:$0xff]  ;;  %v47_v32 = vld [vmem:[#allocation2 + $0x20] sm:$0xff]  ;;  %v48_v34 = vld [vmem:[#allocation2 + $0x28] sm:$0xff] }
  0x30   :  { %1025 = vmatprep.subr.bf16.mxu0 %v1024_v8  ;;  %1050 = vmatprep.subr.bf16.mxu1 %v1024_v8  ;;  %v79_v33 = vld [vmem:[#allocation2 + $0x120] sm:$0xff]  ;;  %v80_v35 = vld [vmem:[#allocation2 + $0x128] sm:$0xff]  ;;  %v49_v36 = vld [vmem:[#allocation2 + $0x30] sm:$0xff] }
  0x31   :  { %v81_v37 = vld [vmem:[#allocation2 + $0x130] sm:$0xff]  ;;  %v50_v38 = vld [vmem:[#allocation2 + $0x38] sm:$0xff]  ;;  %v51_v40 = vld [vmem:[#allocation2 + $0x40] sm:$0xff] }
  0x32   :  { %v82_v39 = vld [vmem:[#allocation2 + $0x138] sm:$0xff]  ;;  %v83_v41 = vld [vmem:[#allocation2 + $0x140] sm:$0xff]  ;;  %v52_v42 = vld [vmem:[#allocation2 + $0x48] sm:$0xff] }
  0x33   :  { %1027 = vmatpush3.bf16.msra.mxu0 %v1024_v8  ;;  %1058 = vmatpush3.bf16.msra.mxu1 %v1024_v8  ;;  %v84_v43 = vld [vmem:[#allocation2 + $0x148] sm:$0xff]  ;;  %v53_v44 = vld [vmem:[#allocation2 + $0x50] sm:$0xff]  ;;  %v54_v46 = vld [vmem:[#allocation2 + $0x58] sm:$0xff] }
  0x34   :  { %1029 = vmatprep.subr.bf16.mxu0 %v1028_v12  ;;  %1051 = vmatprep.subr.bf16.mxu1 %v1028_v12  ;;  %v85_v45 = vld [vmem:[#allocation2 + $0x150] sm:$0xff]  ;;  %v86_v47 = vld [vmem:[#allocation2 + $0x158] sm:$0xff]  ;;  %v55_v48 = vld [vmem:[#allocation2 + $0x60] sm:$0xff] }
  0x35   :  { %v87_v49 = vld [vmem:[#allocation2 + $0x160] sm:$0xff]  ;;  %v56_v50 = vld [vmem:[#allocation2 + $0x68] sm:$0xff]  ;;  %v57_v52 = vld [vmem:[#allocation2 + $0x70] sm:$0xff] }
  0x36   :  { %v88_v51 = vld [vmem:[#allocation2 + $0x168] sm:$0xff]  ;;  %v89_v53 = vld [vmem:[#allocation2 + $0x170] sm:$0xff]  ;;  %v58_v54 = vld [vmem:[#allocation2 + $0x78] sm:$0xff] }
  0x37   :  { %1031 = vmatpush3.bf16.msra.mxu0 %v1028_v12  ;;  %1059 = vmatpush3.bf16.msra.mxu1 %v1028_v12  ;;  %v90_v55 = vld [vmem:[#allocation2 + $0x178] sm:$0xff]  ;;  %v59_v56 = vld [vmem:[#allocation2 + $0x80] sm:$0xff]  ;;  %v60_v58 = vld [vmem:[#allocation2 + $0x88] sm:$0xff] }
  0x38   :  { %1033 = vmatprep.subr.bf16.mxu0 %v1032_v15  ;;  %1052 = vmatprep.subr.bf16.mxu1 %v1032_v15  ;;  %v91_v57 = vld [vmem:[#allocation2 + $0x180] sm:$0xff]  ;;  %v92_v59 = vld [vmem:[#allocation2 + $0x188] sm:$0xff]  ;;  %v61_v60 = vld [vmem:[#allocation2 + $0x90] sm:$0xff] }
  0x39   :  { %v93_v61 = vld [vmem:[#allocation2 + $0x190] sm:$0xff]  ;;  %v62_v62 = vld [vmem:[#allocation2 + $0x98] sm:$0xff]  ;;  %v63_v0 = vld [vmem:[#allocation2 + $0xa0] sm:$0xff] }
  0x3a   :  { %v94_v63 = vld [vmem:[#allocation2 + $0x198] sm:$0xff]  ;;  %v95_v1 = vld [vmem:[#allocation2 + $0x1a0] sm:$0xff]  ;;  %v64_v2 = vld [vmem:[#allocation2 + $0xa8] sm:$0xff] }
  0x3b   :  { %1035 = vmatpush3.bf16.msra.mxu0 %v1032_v15  ;;  %1060 = vmatpush3.bf16.msra.mxu1 %v1032_v15  ;;  %v96_v3 = vld [vmem:[#allocation2 + $0x1a8] sm:$0xff]  ;;  %v65_v4 = vld [vmem:[#allocation2 + $0xb0] sm:$0xff]  ;;  %v66_v6 = vld [vmem:[#allocation2 + $0xb8] sm:$0xff] }
  0x3c   :  { %1037 = vmatprep.subr.bf16.mxu0 %v1036_v19  ;;  %1053 = vmatprep.subr.bf16.mxu1 %v1036_v19  ;;  %v97_v5 = vld [vmem:[#allocation2 + $0x1b0] sm:$0xff]  ;;  %v98_v7 = vld [vmem:[#allocation2 + $0x1b8] sm:$0xff]  ;;  %v67_v8 = vld [vmem:[#allocation2 + $0xc0] sm:$0xff] }
  0x3d   :  { %v99_v9 = vld [vmem:[#allocation2 + $0x1c0] sm:$0xff]  ;;  %v68_v10 = vld [vmem:[#allocation2 + $0xc8] sm:$0xff]  ;;  %v69_v12 = vld [vmem:[#allocation2 + $0xd0] sm:$0xff] }
  0x3e   :  { %v100_v11 = vld [vmem:[#allocation2 + $0x1c8] sm:$0xff]  ;;  %v101_v13 = vld [vmem:[#allocation2 + $0x1d0] sm:$0xff]  ;;  %v70_v14 = vld [vmem:[#allocation2 + $0xd8] sm:$0xff] }
  0x3f   :  { %1039 = vmatpush3.bf16.msra.mxu0 %v1036_v19  ;;  %1061 = vmatpush3.bf16.msra.mxu1 %v1036_v19  ;;  %v102_v15 = vld [vmem:[#allocation2 + $0x1d8] sm:$0xff]  ;;  %v71_v16 = vld [vmem:[#allocation2 + $0xe0] sm:$0xff]  ;;  %v72_v18 = vld [vmem:[#allocation2 + $0xe8] sm:$0xff] }
  0x40   :  { %1041 = vmatprep.subr.bf16.mxu0 %v1040_v22  ;;  %1054 = vmatprep.subr.bf16.mxu1 %v1040_v22  ;;  %v103_v17 = vld [vmem:[#allocation2 + $0x1e0] sm:$0xff]  ;;  %v104_v19 = vld [vmem:[#allocation2 + $0x1e8] sm:$0xff]  ;;  %v73_v20 = vld [vmem:[#allocation2 + $0xf0] sm:$0xff] }
  0x41   :  { %v105_v21 = vld [vmem:[#allocation2 + $0x1f0] sm:$0xff]  ;;  %v106_v23 = vld [vmem:[#allocation2 + $0x1f8] sm:$0xff] }
  0x43   :  { %1043 = vmatpush3.bf16.msra.mxu0 %v1040_v22  ;;  %1062 = vmatpush3.bf16.msra.mxu1 %v1040_v22  ;;  %v74_v22 = vld [vmem:[#allocation2 + $0xf8] sm:$0xff] }
  0x44   :  { %1045 = vmatprep.subr.bf16.mxu0 %v1044_v25  ;;  %1055 = vmatprep.subr.bf16.mxu1 %v1044_v25 }
  0x47   :  { %1047 = vmatpush3.bf16.msra.mxu0 %v1044_v25  ;;  %1063 = vmatpush3.bf16.msra.mxu1 %v1044_v25 }
  0x4a   :  { %921 = vmatmul.mubr.f32.vlgmr.msra.gmra.mrb[0].mxu0 %v44_v26  ;;  %969 = vmatmul.mubr.f32.vlgmr.msra.gmra.mrb[0].mxu1 %v76_v27 }
  0x4b   :  { %923 = vmatprep.mubr.f32.mxu0 %v45_v28  ;;  %971 = vmatprep.mubr.f32.mxu1 %v77_v29 }
  0x4e   :  { %924 = vmatmul.mubr.f32.gmra.mrb[2].mxu0 %v46_v30  ;;  %972 = vmatmul.mubr.f32.gmra.mrb[2].mxu1 %v78_v31 }
  0x4f   :  { %926 = vmatprep.mubr.f32.mxu0 %v47_v32  ;;  %974 = vmatprep.mubr.f32.mxu1 %v79_v33 }
  0x52   :  { %927 = vmatmul.mubr.f32.gmra.mrb[4].mxu0 %v48_v34  ;;  %975 = vmatmul.mubr.f32.gmra.mrb[4].mxu1 %v80_v35 }
  0x53   :  { %929 = vmatprep.mubr.f32.mxu0 %v49_v36  ;;  %977 = vmatprep.mubr.f32.mxu1 %v81_v37 }
  0x56   :  { %930 = vmatmul.mubr.f32.gmra.mrb[6].mxu0 %v50_v38  ;;  %978 = vmatmul.mubr.f32.gmra.mrb[6].mxu1 %v82_v39 }
  0x57   :  { %932 = vmatprep.mubr.f32.mxu0 %v51_v40  ;;  %980 = vmatprep.mubr.f32.mxu1 %v83_v41 }
  0x5a   :  { %933 = vmatmul.mubr.f32.gmra.mrb[8].mxu0 %v52_v42  ;;  %981 = vmatmul.mubr.f32.gmra.mrb[8].mxu1 %v84_v43 }
  0x5b   :  { %935 = vmatprep.mubr.f32.mxu0 %v53_v44  ;;  %983 = vmatprep.mubr.f32.mxu1 %v85_v45 }
  0x5e   :  { %936 = vmatmul.mubr.f32.gmra.mrb[10].mxu0 %v54_v46  ;;  %984 = vmatmul.mubr.f32.gmra.mrb[10].mxu1 %v86_v47 }
  0x5f   :  { %938 = vmatprep.mubr.f32.mxu0 %v55_v48  ;;  %986 = vmatprep.mubr.f32.mxu1 %v87_v49 }
  0x62   :  { %939 = vmatmul.mubr.f32.gmra.mrb[12].mxu0 %v56_v50  ;;  %987 = vmatmul.mubr.f32.gmra.mrb[12].mxu1 %v88_v51 }
  0x63   :  { %941 = vmatprep.mubr.f32.mxu0 %v57_v52  ;;  %989 = vmatprep.mubr.f32.mxu1 %v89_v53 }
  0x66   :  { %942 = vmatmul.mubr.f32.gmra.mrb[14].mxu0 %v58_v54  ;;  %990 = vmatmul.mubr.f32.gmra.mrb[14].mxu1 %v90_v55 }
  0x67   :  { %944 = vmatprep.mubr.f32.mxu0 %v59_v56  ;;  %992 = vmatprep.mubr.f32.mxu1 %v91_v57 }
  0x6a   :  { %945 = vmatmul.mubr.f32.gmra.mrb[16].mxu0 %v60_v58  ;;  %993 = vmatmul.mubr.f32.gmra.mrb[16].mxu1 %v92_v59 }
  0x6b   :  { %947 = vmatprep.mubr.f32.mxu0 %v61_v60  ;;  %995 = vmatprep.mubr.f32.mxu1 %v93_v61 }
  0x6e   :  { %948 = vmatmul.mubr.f32.gmra.mrb[18].mxu0 %v62_v62  ;;  %996 = vmatmul.mubr.f32.gmra.mrb[18].mxu1 %v94_v63 }
  0x6f   :  { %950 = vmatprep.mubr.f32.mxu0 %v63_v0  ;;  %998 = vmatprep.mubr.f32.mxu1 %v95_v1 }
  0x72   :  { %951 = vmatmul.mubr.f32.gmra.mrb[20].mxu0 %v64_v2  ;;  %999 = vmatmul.mubr.f32.gmra.mrb[20].mxu1 %v96_v3 }
  0x73   :  { %953 = vmatprep.mubr.f32.mxu0 %v65_v4  ;;  %1001 = vmatprep.mubr.f32.mxu1 %v97_v5 }
  0x76   :  { %954 = vmatmul.mubr.f32.gmra.mrb[22].mxu0 %v66_v6  ;;  %1002 = vmatmul.mubr.f32.gmra.mrb[22].mxu1 %v98_v7 }
  0x77   :  { %956 = vmatprep.mubr.f32.mxu0 %v67_v8  ;;  %1004 = vmatprep.mubr.f32.mxu1 %v99_v9 }
  0x7a   :  { %957 = vmatmul.mubr.f32.gmra.mrb[24].mxu0 %v68_v10  ;;  %1005 = vmatmul.mubr.f32.gmra.mrb[24].mxu1 %v100_v11 }
  0x7b   :  { %959 = vmatprep.mubr.f32.mxu0 %v69_v12  ;;  %1007 = vmatprep.mubr.f32.mxu1 %v101_v13 }
  0x7e   :  { %960 = vmatmul.mubr.f32.gmra.mrb[26].mxu0 %v70_v14  ;;  %1008 = vmatmul.mubr.f32.gmra.mrb[26].mxu1 %v102_v15 }
  0x7f   :  { %962 = vmatprep.mubr.f32.mxu0 %v71_v16  ;;  %1010 = vmatprep.mubr.f32.mxu1 %v103_v17 }
  0x82   :  { %963 = vmatmul.mubr.f32.gmra.mrb[28].mxu0 %v72_v18  ;;  %1011 = vmatmul.mubr.f32.gmra.mrb[28].mxu1 %v104_v19 }
  0x83   :  { %965 = vmatprep.mubr.f32.mxu0 %v73_v20  ;;  %1013 = vmatprep.mubr.f32.mxu1 %v105_v21 }
  0x86   :  { %966 = vmatmul.mubr.f32.gmra.mrb[30].mxu0 %v74_v22  ;;  %1014 = vmatmul.mubr.f32.gmra.mrb[30].mxu1 %v106_v23 }
 0x11d   :  { %v922_v24 = vpop.f32.mrb[0].mxu0  ;;  %v1222_v25 = vpop.f32.mrb[0].mxu1 }
 0x11e   :  { %509 = vst [vmem:[#allocation7 + $0x8] sm:$0xff] %v922_v24  ;;  %v643_v26 = vmul.f32 %v922_v24, %v922_v24  ;;  %v189_v27 = vpop.f32.mrb[1].mxu0  ;;  %541 = vst [vmem:[#allocation7 + $0x108] sm:$0xff] %v1222_v25  ;;  %v1225_v28 = vpop.f32.mrb[1].mxu1 }
 0x11f   :  { %508 = vst [vmem:[#allocation7] sm:$0xff] %v189_v27  ;;  %v572_v29 = vadd.f32 %v922_v24, %v189_v27  ;;  %v642_v30 = vmul.f32 %v189_v27, %v189_v27  ;;  %540 = vst [vmem:[#allocation7 + $0x100] sm:$0xff] %v1225_v28 }
 0x121   :  { %v706_v31 = vadd.f32 %v643_v26, %v642_v30  ;;  %v925_v32 = vpop.f32.mrb[2].mxu0  ;;  %v1228_v33 = vpop.f32.mrb[2].mxu1 }
 0x122   :  { %511 = vst [vmem:[#allocation7 + $0x18] sm:$0xff] %v925_v32  ;;  %v199_v34 = vpop.f32.mrb[3].mxu0  ;;  %543 = vst [vmem:[#allocation7 + $0x118] sm:$0xff] %v1228_v33  ;;  %v1231_v35 = vpop.f32.mrb[3].mxu1  ;;  %v645_v38 = vmul.f32 %v925_v32, %v925_v32 }
 0x123   :  { %510 = vst [vmem:[#allocation7 + $0x10] sm:$0xff] %v199_v34  ;;  %v573_v36 = vadd.f32 %v572_v29, %v199_v34  ;;  %v644_v37 = vmul.f32 %v199_v34, %v199_v34  ;;  %542 = vst [vmem:[#allocation7 + $0x110] sm:$0xff] %v1231_v35 }
 0x125   :  { %v707_v39 = vadd.f32 %v706_v31, %v644_v37  ;;  %v928_v40 = vpop.f32.mrb[4].mxu0  ;;  %v574_v41 = vadd.f32 %v925_v32, %v573_v36  ;;  %v1234_v42 = vpop.f32.mrb[4].mxu1 }
 0x126   :  { %513 = vst [vmem:[#allocation7 + $0x28] sm:$0xff] %v928_v40  ;;  %v209_v43 = vpop.f32.mrb[5].mxu0  ;;  %545 = vst [vmem:[#allocation7 + $0x128] sm:$0xff] %v1234_v42  ;;  %v1237_v44 = vpop.f32.mrb[5].mxu1  ;;  %v647_v48 = vmul.f32 %v928_v40, %v928_v40 }
 0x127   :  { %512 = vst [vmem:[#allocation7 + $0x20] sm:$0xff] %v209_v43  ;;  %v575_v45 = vadd.f32 %v574_v41, %v209_v43  ;;  %v646_v46 = vmul.f32 %v209_v43, %v209_v43  ;;  %v708_v47 = vadd.f32 %v707_v39, %v645_v38  ;;  %544 = vst [vmem:[#allocation7 + $0x120] sm:$0xff] %v1237_v44 }
 0x129   :  { %v709_v49 = vadd.f32 %v708_v47, %v646_v46  ;;  %v931_v50 = vpop.f32.mrb[6].mxu0  ;;  %v576_v51 = vadd.f32 %v928_v40, %v575_v45  ;;  %v1240_v52 = vpop.f32.mrb[6].mxu1 }
 0x12a   :  { %515 = vst [vmem:[#allocation7 + $0x38] sm:$0xff] %v931_v50  ;;  %v219_v53 = vpop.f32.mrb[7].mxu0  ;;  %547 = vst [vmem:[#allocation7 + $0x138] sm:$0xff] %v1240_v52  ;;  %v1243_v54 = vpop.f32.mrb[7].mxu1  ;;  %v649_v58 = vmul.f32 %v931_v50, %v931_v50 }
 0x12b   :  { %514 = vst [vmem:[#allocation7 + $0x30] sm:$0xff] %v219_v53  ;;  %v577_v55 = vadd.f32 %v576_v51, %v219_v53  ;;  %v648_v56 = vmul.f32 %v219_v53, %v219_v53  ;;  %v710_v57 = vadd.f32 %v709_v49, %v647_v48  ;;  %546 = vst [vmem:[#allocation7 + $0x130] sm:$0xff] %v1243_v54 }
 0x12d   :  { %v711_v59 = vadd.f32 %v710_v57, %v648_v56  ;;  %v934_v60 = vpop.f32.mrb[8].mxu0  ;;  %v578_v61 = vadd.f32 %v931_v50, %v577_v55  ;;  %v1246_v62 = vpop.f32.mrb[8].mxu1 }
 0x12e   :  { %517 = vst [vmem:[#allocation7 + $0x48] sm:$0xff] %v934_v60  ;;  %v229_v63 = vpop.f32.mrb[9].mxu0  ;;  %549 = vst [vmem:[#allocation7 + $0x148] sm:$0xff] %v1246_v62  ;;  %v1249_v0 = vpop.f32.mrb[9].mxu1  ;;  %v651_v4 = vmul.f32 %v934_v60, %v934_v60 }
 0x12f   :  { %516 = vst [vmem:[#allocation7 + $0x40] sm:$0xff] %v229_v63  ;;  %v579_v1 = vadd.f32 %v578_v61, %v229_v63  ;;  %v650_v2 = vmul.f32 %v229_v63, %v229_v63  ;;  %v712_v3 = vadd.f32 %v711_v59, %v649_v58  ;;  %548 = vst [vmem:[#allocation7 + $0x140] sm:$0xff] %v1249_v0 }
 0x131   :  { %v713_v5 = vadd.f32 %v712_v3, %v650_v2  ;;  %v937_v6 = vpop.f32.mrb[10].mxu0  ;;  %v580_v7 = vadd.f32 %v934_v60, %v579_v1  ;;  %v1252_v8 = vpop.f32.mrb[10].mxu1 }
 0x132   :  { %519 = vst [vmem:[#allocation7 + $0x58] sm:$0xff] %v937_v6  ;;  %v239_v9 = vpop.f32.mrb[11].mxu0  ;;  %551 = vst [vmem:[#allocation7 + $0x158] sm:$0xff] %v1252_v8  ;;  %v1255_v10 = vpop.f32.mrb[11].mxu1  ;;  %v653_v14 = vmul.f32 %v937_v6, %v937_v6 }
 0x133   :  { %518 = vst [vmem:[#allocation7 + $0x50] sm:$0xff] %v239_v9  ;;  %v581_v11 = vadd.f32 %v580_v7, %v239_v9  ;;  %v652_v12 = vmul.f32 %v239_v9, %v239_v9  ;;  %v714_v13 = vadd.f32 %v713_v5, %v651_v4  ;;  %550 = vst [vmem:[#allocation7 + $0x150] sm:$0xff] %v1255_v10 }
 0x135   :  { %v715_v15 = vadd.f32 %v714_v13, %v652_v12  ;;  %v940_v16 = vpop.f32.mrb[12].mxu0  ;;  %v582_v17 = vadd.f32 %v937_v6, %v581_v11  ;;  %v1258_v18 = vpop.f32.mrb[12].mxu1 }
 0x136   :  { %521 = vst [vmem:[#allocation7 + $0x68] sm:$0xff] %v940_v16  ;;  %v249_v19 = vpop.f32.mrb[13].mxu0  ;;  %553 = vst [vmem:[#allocation7 + $0x168] sm:$0xff] %v1258_v18  ;;  %v1261_v20 = vpop.f32.mrb[13].mxu1  ;;  %v655_v24 = vmul.f32 %v940_v16, %v940_v16 }
 0x137   :  { %520 = vst [vmem:[#allocation7 + $0x60] sm:$0xff] %v249_v19  ;;  %v583_v21 = vadd.f32 %v582_v17, %v249_v19  ;;  %v654_v22 = vmul.f32 %v249_v19, %v249_v19  ;;  %v716_v23 = vadd.f32 %v715_v15, %v653_v14  ;;  %552 = vst [vmem:[#allocation7 + $0x160] sm:$0xff] %v1261_v20 }
 0x139   :  { %v717_v26 = vadd.f32 %v716_v23, %v654_v22  ;;  %v943_v27 = vpop.f32.mrb[14].mxu0  ;;  %v584_v29 = vadd.f32 %v940_v16, %v583_v21  ;;  %v1264_v30 = vpop.f32.mrb[14].mxu1 }
 0x13a   :  { %523 = vst [vmem:[#allocation7 + $0x78] sm:$0xff] %v943_v27  ;;  %v259_v31 = vpop.f32.mrb[15].mxu0  ;;  %555 = vst [vmem:[#allocation7 + $0x178] sm:$0xff] %v1264_v30  ;;  %v1267_v32 = vpop.f32.mrb[15].mxu1  ;;  %v657_v38 = vmul.f32 %v943_v27, %v943_v27 }
 0x13b   :  { %522 = vst [vmem:[#allocation7 + $0x70] sm:$0xff] %v259_v31  ;;  %v585_v34 = vadd.f32 %v584_v29, %v259_v31  ;;  %v656_v36 = vmul.f32 %v259_v31, %v259_v31  ;;  %v718_v37 = vadd.f32 %v717_v26, %v655_v24  ;;  %554 = vst [vmem:[#allocation7 + $0x170] sm:$0xff] %v1267_v32 }
 0x13d   :  { %v719_v39 = vadd.f32 %v718_v37, %v656_v36  ;;  %v946_v40 = vpop.f32.mrb[16].mxu0  ;;  %v586_v41 = vadd.f32 %v943_v27, %v585_v34  ;;  %v1270_v43 = vpop.f32.mrb[16].mxu1 }
 0x13e   :  { %525 = vst [vmem:[#allocation7 + $0x88] sm:$0xff] %v946_v40  ;;  %v269_v45 = vpop.f32.mrb[17].mxu0  ;;  %557 = vst [vmem:[#allocation7 + $0x188] sm:$0xff] %v1270_v43  ;;  %v1273_v46 = vpop.f32.mrb[17].mxu1  ;;  %v659_v50 = vmul.f32 %v946_v40, %v946_v40 }
 0x13f   :  { %524 = vst [vmem:[#allocation7 + $0x80] sm:$0xff] %v269_v45  ;;  %v587_v47 = vadd.f32 %v586_v41, %v269_v45  ;;  %v658_v48 = vmul.f32 %v269_v45, %v269_v45  ;;  %v720_v49 = vadd.f32 %v719_v39, %v657_v38  ;;  %556 = vst [vmem:[#allocation7 + $0x180] sm:$0xff] %v1273_v46 }
 0x141   :  { %v721_v51 = vadd.f32 %v720_v49, %v658_v48  ;;  %v949_v53 = vpop.f32.mrb[18].mxu0  ;;  %v588_v55 = vadd.f32 %v946_v40, %v587_v47  ;;  %v1276_v56 = vpop.f32.mrb[18].mxu1 }
 0x142   :  { %527 = vst [vmem:[#allocation7 + $0x98] sm:$0xff] %v949_v53  ;;  %v279_v57 = vpop.f32.mrb[19].mxu0  ;;  %559 = vst [vmem:[#allocation7 + $0x198] sm:$0xff] %v1276_v56  ;;  %v1279_v58 = vpop.f32.mrb[19].mxu1  ;;  %v661_v63 = vmul.f32 %v949_v53, %v949_v53 }
 0x143   :  { %526 = vst [vmem:[#allocation7 + $0x90] sm:$0xff] %v279_v57  ;;  %v589_v59 = vadd.f32 %v588_v55, %v279_v57  ;;  %v660_v60 = vmul.f32 %v279_v57, %v279_v57  ;;  %v722_v61 = vadd.f32 %v721_v51, %v659_v50  ;;  %558 = vst [vmem:[#allocation7 + $0x190] sm:$0xff] %v1279_v58 }
 0x145   :  { %v723_v1 = vadd.f32 %v722_v61, %v660_v60  ;;  %v952_v2 = vpop.f32.mrb[20].mxu0  ;;  %v590_v3 = vadd.f32 %v949_v53, %v589_v59  ;;  %v1282_v4 = vpop.f32.mrb[20].mxu1 }
 0x146   :  { %529 = vst [vmem:[#allocation7 + $0xa8] sm:$0xff] %v952_v2  ;;  %v289_v5 = vpop.f32.mrb[21].mxu0  ;;  %561 = vst [vmem:[#allocation7 + $0x1a8] sm:$0xff] %v1282_v4  ;;  %v1285_v6 = vpop.f32.mrb[21].mxu1  ;;  %v663_v12 = vmul.f32 %v952_v2, %v952_v2 }
 0x147   :  { %528 = vst [vmem:[#allocation7 + $0xa0] sm:$0xff] %v289_v5  ;;  %v591_v7 = vadd.f32 %v590_v3, %v289_v5  ;;  %v662_v9 = vmul.f32 %v289_v5, %v289_v5  ;;  %v724_v11 = vadd.f32 %v723_v1, %v661_v63  ;;  %560 = vst [vmem:[#allocation7 + $0x1a0] sm:$0xff] %v1285_v6 }
 0x149   :  { %v725_v13 = vadd.f32 %v724_v11, %v662_v9  ;;  %v955_v14 = vpop.f32.mrb[22].mxu0  ;;  %v592_v15 = vadd.f32 %v952_v2, %v591_v7  ;;  %v1288_v16 = vpop.f32.mrb[22].mxu1 }
 0x14a   :  { %531 = vst [vmem:[#allocation7 + $0xb8] sm:$0xff] %v955_v14  ;;  %v299_v17 = vpop.f32.mrb[23].mxu0  ;;  %563 = vst [vmem:[#allocation7 + $0x1b8] sm:$0xff] %v1288_v16  ;;  %v1291_v19 = vpop.f32.mrb[23].mxu1  ;;  %v665_v24 = vmul.f32 %v955_v14, %v955_v14 }
 0x14b   :  { %530 = vst [vmem:[#allocation7 + $0xb0] sm:$0xff] %v299_v17  ;;  %v593_v21 = vadd.f32 %v592_v15, %v299_v17  ;;  %v664_v22 = vmul.f32 %v299_v17, %v299_v17  ;;  %v726_v23 = vadd.f32 %v725_v13, %v663_v12  ;;  %562 = vst [vmem:[#allocation7 + $0x1b0] sm:$0xff] %v1291_v19 }
 0x14d   :  { %v727_v26 = vadd.f32 %v726_v23, %v664_v22  ;;  %v958_v27 = vpop.f32.mrb[24].mxu0  ;;  %v594_v29 = vadd.f32 %v955_v14, %v593_v21  ;;  %v1294_v31 = vpop.f32.mrb[24].mxu1 }
 0x14e   :  { %533 = vst [vmem:[#allocation7 + $0xc8] sm:$0xff] %v958_v27  ;;  %v309_v34 = vpop.f32.mrb[25].mxu0  ;;  %565 = vst [vmem:[#allocation7 + $0x1c8] sm:$0xff] %v1294_v31  ;;  %v1297_v36 = vpop.f32.mrb[25].mxu1  ;;  %v667_v40 = vmul.f32 %v958_v27, %v958_v27 }
 0x14f   :  { %532 = vst [vmem:[#allocation7 + $0xc0] sm:$0xff] %v309_v34  ;;  %v595_v37 = vadd.f32 %v594_v29, %v309_v34  ;;  %v666_v38 = vmul.f32 %v309_v34, %v309_v34  ;;  %v728_v39 = vadd.f32 %v727_v26, %v665_v24  ;;  %564 = vst [vmem:[#allocation7 + $0x1c0] sm:$0xff] %v1297_v36 }
 0x151   :  { %v729_v41 = vadd.f32 %v728_v39, %v666_v38  ;;  %v961_v45 = vpop.f32.mrb[26].mxu0  ;;  %v596_v47 = vadd.f32 %v958_v27, %v595_v37  ;;  %v1300_v48 = vpop.f32.mrb[26].mxu1 }
 0x152   :  { %535 = vst [vmem:[#allocation7 + $0xd8] sm:$0xff] %v961_v45  ;;  %v319_v49 = vpop.f32.mrb[27].mxu0  ;;  %567 = vst [vmem:[#allocation7 + $0x1d8] sm:$0xff] %v1300_v48  ;;  %v1303_v50 = vpop.f32.mrb[27].mxu1  ;;  %v669_v57 = vmul.f32 %v961_v45, %v961_v45 }
 0x153   :  { %534 = vst [vmem:[#allocation7 + $0xd0] sm:$0xff] %v319_v49  ;;  %v597_v51 = vadd.f32 %v596_v47, %v319_v49  ;;  %v668_v53 = vmul.f32 %v319_v49, %v319_v49  ;;  %v730_v55 = vadd.f32 %v729_v41, %v667_v40  ;;  %566 = vst [vmem:[#allocation7 + $0x1d0] sm:$0xff] %v1303_v50 }
 0x155   :  { %v731_v59 = vadd.f32 %v730_v55, %v668_v53  ;;  %v964_v60 = vpop.f32.mrb[28].mxu0  ;;  %v598_v61 = vadd.f32 %v961_v45, %v597_v51  ;;  %v1306_v63 = vpop.f32.mrb[28].mxu1 }
 0x156   :  { %537 = vst [vmem:[#allocation7 + $0xe8] sm:$0xff] %v964_v60  ;;  %v329_v1 = vpop.f32.mrb[29].mxu0  ;;  %569 = vst [vmem:[#allocation7 + $0x1e8] sm:$0xff] %v1306_v63  ;;  %v1309_v2 = vpop.f32.mrb[29].mxu1  ;;  %v671_v9 = vmul.f32 %v964_v60, %v964_v60 }
 0x157   :  { %536 = vst [vmem:[#allocation7 + $0xe0] sm:$0xff] %v329_v1  ;;  %v599_v3 = vadd.f32 %v598_v61, %v329_v1  ;;  %v670_v5 = vmul.f32 %v329_v1, %v329_v1  ;;  %v732_v7 = vadd.f32 %v731_v59, %v669_v57  ;;  %568 = vst [vmem:[#allocation7 + $0x1e0] sm:$0xff] %v1309_v2 }
 0x159   :  { %v733_v11 = vadd.f32 %v732_v7, %v670_v5  ;;  %v967_v12 = vpop.f32.mrb[30].mxu0  ;;  %v600_v13 = vadd.f32 %v964_v60, %v599_v3  ;;  %v1312_v14 = vpop.f32.mrb[30].mxu1 }
 0x15a   :  { %539 = vst [vmem:[#allocation7 + $0xf8] sm:$0xff] %v967_v12  ;;  %v339_v15 = vpop.f32.mrb[31].mxu0  ;;  %571 = vst [vmem:[#allocation7 + $0x1f8] sm:$0xff] %v1312_v14  ;;  %v1315_v17 = vpop.f32.mrb[31].mxu1 }
 0x15b   :  { %538 = vst [vmem:[#allocation7 + $0xf0] sm:$0xff] %v339_v15  ;;  %v601_v21 = vadd.f32 %v600_v13, %v339_v15  ;;  %v672_v22 = vmul.f32 %v339_v15, %v339_v15  ;;  %v734_v23 = vadd.f32 %v733_v11, %v671_v9  ;;  %570 = vst [vmem:[#allocation7 + $0x1f0] sm:$0xff] %v1315_v17 }
 0x15c   :  { %1125 = shalt.err (!%p1122_p6)
}
 0x15d   :  { %s1126_s14 = scalar_lea.hbm %s1443_s2, 8192 }
 0x15e   :  { %p1127_p7 = scmp.ne.s32.totalorder %s1443_s2, %s1126_s14  ;;  %p1130_p8 = scmp.lt.u32.totalorder %s1126_s14, %s1443_s2 }
 0x160   :  { %p1132_p9 = pnand %p1130_p8, %p1127_p7 }
 0x162   :  { %1135 = shalt.err (!%p1132_p9)
}
 0x163   :  { %787 = dma.vmem_to_hbm [thread:$0]  %s782_s10, 8192, %s1443_s2, [#allocation4], %s1167_s22, %s1167_s22, %s1168_s23   ;;  %v673_v24 = vmul.f32 %v967_v12, %v967_v12  ;;  %v602_v26 = vadd.f32 %v967_v12, %v601_v21  ;;  %v735_v27 = vadd.f32 %v734_v23, %v672_v22  ;;  %v674_v29 = vmul.f32 %v1225_v28, %v1225_v28 }
 0x164   :  { %v675_v38 = vmul.f32 %v1222_v25, %v1222_v25  ;;  %v676_v41 = vmul.f32 %v1231_v35, %v1231_v35  ;;  %v677_v49 = vmul.f32 %v1228_v33, %v1228_v33  ;;  %s1171_s2 = smov [#allocation8]  }
 0x165   :  { %v736_v34 = vadd.f32 %v735_v27, %v673_v24  ;;  %v603_v37 = vadd.f32 %v602_v26, %v1225_v28  ;;  %v678_v28 = vmul.f32 %v1237_v44, %v1237_v44  ;;  %s794_s21 = sshll.u32 %s1171_s2, 4  ;;  %s795_s21 = int_to_ptr.vmem [resolvable:$true] %s794_s21 }
 0x166   :  { %s1136_s22 = scalar_lea.vmem %s795_s21, 32  ;;  %p1141_p11 = scmp.lt.s32.totalorder %s795_s21, %s795_s21 }
 0x167   :  { %v737_v39 = vadd.f32 %v736_v34, %v674_v29  ;;  %v604_v40 = vadd.f32 %v1222_v25, %v603_v37  ;;  %v679_v25 = vmul.f32 %v1234_v42, %v1234_v42  ;;  %p1137_p10 = scmp.ne.s32.totalorder %s795_s21, %s1136_s22  ;;  %p1142_p12 = scmp.lt.s32.totalorder %s1136_s22, %s1136_s22 }
 0x169   :  { %v605_v45 = vadd.f32 %v604_v40, %v1231_v35  ;;  %v738_v47 = vadd.f32 %v737_v39, %v675_v38  ;;  %v680_v35 = vmul.f32 %v1243_v54, %v1243_v54  ;;  %p1143_p13 = por %p1142_p12, %p1141_p11 }
 0x16b   :  { %v739_v51 = vadd.f32 %v738_v47, %v676_v41  ;;  %v606_v53 = vadd.f32 %v1228_v33, %v605_v45  ;;  %v681_v33 = vmul.f32 %v1240_v52, %v1240_v52  ;;  %p1144_p0 = pnand %p1143_p13, %p1137_p10 }
 0x16d   :  { %v607_v55 = vadd.f32 %v606_v53, %v1237_v44  ;;  %v740_v57 = vadd.f32 %v739_v51, %v677_v49  ;;  %v682_v44 = vmul.f32 %v1249_v0, %v1249_v0 }
 0x16f   :  { %v741_v59 = vadd.f32 %v740_v57, %v678_v28  ;;  %v608_v60 = vadd.f32 %v1234_v42, %v607_v55  ;;  %v683_v42 = vmul.f32 %v1246_v62, %v1246_v62 }
 0x171   :  { %v609_v61 = vadd.f32 %v608_v60, %v1243_v54  ;;  %v742_v1 = vadd.f32 %v741_v59, %v679_v25  ;;  %v684_v54 = vmul.f32 %v1255_v10, %v1255_v10 }
 0x173   :  { %v743_v3 = vadd.f32 %v742_v1, %v680_v35  ;;  %v610_v5 = vadd.f32 %v1240_v52, %v609_v61  ;;  %v685_v52 = vmul.f32 %v1252_v8, %v1252_v8 }
 0x175   :  { %v611_v7 = vadd.f32 %v610_v5, %v1249_v0  ;;  %v744_v9 = vadd.f32 %v743_v3, %v681_v33  ;;  %v686_v0 = vmul.f32 %v1261_v20, %v1261_v20 }
 0x177   :  { %v745_v11 = vadd.f32 %v744_v9, %v682_v44  ;;  %v612_v12 = vadd.f32 %v1246_v62, %v611_v7  ;;  %v687_v62 = vmul.f32 %v1258_v18, %v1258_v18 }
 0x179   :  { %v613_v13 = vadd.f32 %v612_v12, %v1255_v10  ;;  %v746_v15 = vadd.f32 %v745_v11, %v683_v42  ;;  %v688_v10 = vmul.f32 %v1267_v32, %v1267_v32 }
 0x17b   :  { %v747_v21 = vadd.f32 %v746_v15, %v684_v54  ;;  %v614_v22 = vadd.f32 %v1252_v8, %v613_v13  ;;  %v689_v8 = vmul.f32 %v1264_v30, %v1264_v30 }
 0x17d   :  { %v615_v23 = vadd.f32 %v614_v22, %v1261_v20  ;;  %v748_v24 = vadd.f32 %v747_v21, %v685_v52  ;;  %v690_v20 = vmul.f32 %v1273_v46, %v1273_v46 }
 0x17f   :  { %v749_v26 = vadd.f32 %v748_v24, %v686_v0  ;;  %v616_v27 = vadd.f32 %v1258_v18, %v615_v23  ;;  %v691_v18 = vmul.f32 %v1270_v43, %v1270_v43 }
 0x181   :  { %v617_v29 = vadd.f32 %v616_v27, %v1267_v32  ;;  %v750_v34 = vadd.f32 %v749_v26, %v687_v62  ;;  %v692_v32 = vmul.f32 %v1279_v58, %v1279_v58 }
 0x183   :  { %v751_v37 = vadd.f32 %v750_v34, %v688_v10  ;;  %v618_v38 = vadd.f32 %v1264_v30, %v617_v29  ;;  %v693_v30 = vmul.f32 %v1276_v56, %v1276_v56 }
 0x185   :  { %v619_v39 = vadd.f32 %v618_v38, %v1273_v46  ;;  %v752_v40 = vadd.f32 %v751_v37, %v689_v8  ;;  %v694_v46 = vmul.f32 %v1285_v6, %v1285_v6 }
 0x187   :  { %v753_v41 = vadd.f32 %v752_v40, %v690_v20  ;;  %v620_v45 = vadd.f32 %v1270_v43, %v619_v39  ;;  %v695_v43 = vmul.f32 %v1282_v4, %v1282_v4 }
 0x189   :  { %v621_v47 = vadd.f32 %v620_v45, %v1279_v58  ;;  %v754_v49 = vadd.f32 %v753_v41, %v691_v18  ;;  %v696_v58 = vmul.f32 %v1291_v19, %v1291_v19 }
 0x18b   :  { %v755_v51 = vadd.f32 %v754_v49, %v692_v32  ;;  %v622_v53 = vadd.f32 %v1276_v56, %v621_v47  ;;  %v697_v56 = vmul.f32 %v1288_v16, %v1288_v16 }
 0x18d   :  { %v623_v28 = vadd.f32 %v622_v53, %v1285_v6  ;;  %v756_v55 = vadd.f32 %v755_v51, %v693_v30  ;;  %v698_v6 = vmul.f32 %v1297_v36, %v1297_v36 }
 0x18f   :  { %v757_v57 = vadd.f32 %v756_v55, %v694_v46  ;;  %v624_v25 = vadd.f32 %v1282_v4, %v623_v28  ;;  %v699_v4 = vmul.f32 %v1294_v31, %v1294_v31 }
 0x191   :  { %v625_v59 = vadd.f32 %v624_v25, %v1291_v19  ;;  %v758_v60 = vadd.f32 %v757_v57, %v695_v43  ;;  %v700_v19 = vmul.f32 %v1303_v50, %v1303_v50 }
 0x193   :  { %v759_v35 = vadd.f32 %v758_v60, %v696_v58  ;;  %v626_v61 = vadd.f32 %v1288_v16, %v625_v59  ;;  %v701_v16 = vmul.f32 %v1300_v48, %v1300_v48 }
 0x195   :  { %v627_v1 = vadd.f32 %v626_v61, %v1297_v36  ;;  %v760_v33 = vadd.f32 %v759_v35, %v697_v56  ;;  %v702_v36 = vmul.f32 %v1309_v2, %v1309_v2 }
 0x197   :  { %v761_v3 = vadd.f32 %v760_v33, %v698_v6  ;;  %v628_v5 = vadd.f32 %v1294_v31, %v627_v1  ;;  %v703_v31 = vmul.f32 %v1306_v63, %v1306_v63 }
 0x199   :  { %v629_v44 = vadd.f32 %v628_v5, %v1303_v50  ;;  %v762_v7 = vadd.f32 %v761_v3, %v699_v4  ;;  %v704_v50 = vmul.f32 %v1315_v17, %v1315_v17 }
 0x19b   :  { %v763_v9 = vadd.f32 %v762_v7, %v700_v19  ;;  %v630_v42 = vadd.f32 %v1300_v48, %v629_v44  ;;  %v705_v48 = vmul.f32 %v1312_v14, %v1312_v14 }
 0x19d   :  { %v631_v11 = vadd.f32 %v630_v42, %v1309_v2  ;;  %v764_v12 = vadd.f32 %v763_v9, %v701_v16 }
 0x19f   :  { %v765_v54 = vadd.f32 %v764_v12, %v702_v36  ;;  %v632_v13 = vadd.f32 %v1306_v63, %v631_v11 }
 0x1a1   :  { %v633_v15 = vadd.f32 %v632_v13, %v1315_v17  ;;  %v766_v52 = vadd.f32 %v765_v54, %v703_v31 }
 0x1a3   :  { %v634_v21 = vadd.f32 %v1312_v14, %v633_v15  ;;  %v767_v22 = vadd.f32 %v766_v52, %v704_v50 }
 0x1a5   :  { %v635_v2 = vrot.slane %v634_v21, 4  ;;  %v768_v0 = vadd.f32 %v767_v22, %v705_v48 }
 0x1a7   :  { %v636_v23 = vadd.f32 %v635_v2, %v634_v21  ;;  %v769_v24 = vrot.slane %v768_v0, 4 }
 0x1a9   :  { %v637_v62 = vrot.slane %v636_v23, 2  ;;  %v770_v26 = vadd.f32 %v769_v24, %v768_v0 }
 0x1ab   :  { %v638_v27 = vadd.f32 %v637_v62, %v636_v23  ;;  %v771_v63 = vrot.slane %v770_v26, 2 }
 0x1ad   :  { %v639_v10 = vrot.slane %v638_v27, 1  ;;  %v772_v29 = vadd.f32 %v771_v63, %v770_v26 }
 0x1af   :  { %v640_v17 = vadd.f32 %v639_v10, %v638_v27  ;;  %v773_v34 = vrot.slane %v772_v29, 1 }
 0x1b1   :  { %641 = vst [vmem:[#allocation8] sm:$0x1] %v640_v17  ;;  %v774_v8 = vadd.f32 %v773_v34, %v772_v29 }
 0x1b3   :  { %775 = vst [vmem:[#allocation8 + $0x1] sm:$0x1] %v774_v8 }
 0x1b4   :  { %1147 = shalt.err (!%p1144_p0)
}
 0x1b5   :  { %s1148_s25 = scalar_lea.hbm %s1444_s3, 32 }
 0x1b6   :  { %p1149_p1 = scmp.ne.s32.totalorder %s1444_s3, %s1148_s25  ;;  %p1152_p2 = scmp.lt.u32.totalorder %s1148_s25, %s1444_s3 }
 0x1b8   :  { %p1154_p3 = pnand %p1152_p2, %p1149_p1 }
 0x1ba   :  { %1157 = shalt.err (!%p1154_p3)
}
 0x1bb   :  { %797 = dma.vmem_to_hbm [thread:$0]  %s795_s21, 32, %s1444_s3, [#allocation9]  }
 0x1bc   :  { %1162 = dma.done.wait [#allocation4], 8192  }
 0x1bd   :  { %1163 = vsyncadd [#allocation4], 4294959104 }
 0x1be   :  { %1164 = dma.done.wait [#allocation9], 32  }
 0x1bf   :  { %1165 = vsyncadd [#allocation9], 4294967264 }
 0x1c0   :  { %804 = vsyncpa [#allocation3], 1 }
 0x1c1   :  { %805 = vsyncpa [#allocation6], 1 }
 0x1c2   :  { %806 = vsyncpa [#allocation4], 1 }
 0x1c3   :  { %807 = vsyncpa [#allocation9], 1 }

</bundles_post_ra>
